<compile_context>
chip_gen: v7x
topology: tpu7x:2x2x1
jax: 0.10.0
libtpu: 0.0.40
codegen_flags: <defaults>
</compile_context>

<pallas_src>
import math

import jax
import jax.numpy as jnp
from jax.experimental import pallas as pl
from jax.experimental.pallas import tpu as pltpu


def _linear_kernel(x_ref, w_ref, b_ref, o_ref):
    # One row tile: (TM, E) @ (E, N_pad) + (1, N_pad) -> (TM, N_pad)
    acc = jnp.dot(x_ref[...], w_ref[...], preferred_element_type=jnp.float32)
    o_ref[...] = (acc + b_ref[...]).astype(o_ref.dtype)


def embedding_forward(x, weight, bias, *, row_tile=128):
    """Embedding.forward == nn.Linear.

    x:      (..., in_features)
    weight: (in_features, out_features)   # (in, out) layout -> x @ W + b
    bias:   (out_features,)
    returns (..., out_features) in float32
    """
    in_features, out_features = weight.shape
    lead = x.shape[:-1]
    M = math.prod(lead) if lead else 1
    x2 = x.reshape(M, in_features)

    # ---- lane-dense output: pad out_features up to a multiple of 128 ----
    LANE = 128
    n_pad = max(LANE, pl.cdiv(out_features, LANE) * LANE)
    w_p = jnp.zeros((in_features, n_pad), jnp.float32).at[:, :out_features].set(
        weight.astype(jnp.float32))
    b_p = jnp.zeros((1, n_pad), jnp.float32).at[0, :out_features].set(
        bias.astype(jnp.float32))

    # ---- flatten all leading dims into one row axis, tile rows ----
    tm = min(row_tile, max(8, pl.cdiv(M, 8) * 8))   # sublane-aligned row tile
    m_pad = pl.cdiv(M, tm) * tm
    if m_pad != M:
        x2 = jnp.zeros((m_pad, in_features), x2.dtype).at[:M].set(x2)

    grid = (m_pad // tm,)

    out = pl.pallas_call(
        _linear_kernel,
        out_shape=jax.ShapeDtypeStruct((m_pad, n_pad), jnp.float32),
        grid_spec=pltpu.PrefetchScalarGridSpec(
            num_scalar_prefetch=0,
            grid=grid,
            in_specs=[
                pl.BlockSpec((tm, in_features), lambda i: (i, 0)),   # x rows
                pl.BlockSpec((in_features, n_pad), lambda i: (0, 0)),  # weight
                pl.BlockSpec((1, n_pad), lambda i: (0, 0)),            # bias
            ],
            out_specs=pl.BlockSpec((tm, n_pad), lambda i: (i, 0)),
        ),
        compiler_params=pltpu.CompilerParams(
            dimension_semantics=("parallel",)),
    )(x2, w_p, b_p)

    return out[:M, :out_features].reshape(*lead, out_features)


def init_params(key, in_features, out_features):
    """PyTorch nn.Linear default init; weight stored as (in, out)."""
    kw, kb = jax.random.split(key)
    bound = 1.0 / jnp.sqrt(in_features)
    w = jax.random.uniform(kw, (in_features, out_features), jnp.float32, -bound, bound)
    b = jax.random.uniform(kb, (out_features,), jnp.float32, -bound, bound)
    return w, b


def reference_forward(x, weight, bias):
    """Pure-JAX reference mirroring the PyTorch module."""
    return x @ weight + bias


if __name__ == "__main__":
    # Shapes consistent with how Embedding is used inside DQN_transformer:
    # (batch, seq, input_dim) -> (batch, seq, d_model)
    B, S = 2, 8
    input_dim, output_dim = 4, 32

    key = jax.random.PRNGKey(0)
    kx, kp = jax.random.split(key)
    x = jax.random.normal(kx, (B, S, input_dim), jnp.float32)
    weight, bias = init_params(kp, input_dim, output_dim)

    out = embedding_forward(x, weight, bias)
    out = jax.block_until_ready(out)

    ref = jax.block_until_ready(reference_forward(x, weight, bias))
    assert out.shape == (B, S, output_dim), out.shape
    assert jnp.allclose(out, ref, atol=1e-5, rtol=1e-5), (
        float(jnp.max(jnp.abs(out - ref))))

    print("KERNEL_OK")
</pallas_src>

<mosaic_0001>
module attributes {stable_mosaic.version = 11 : i64} {
  func.func @_linear_kernel(%arg0: i32, %arg1: memref<16x4xf32, #tpu.memory_space<vmem>>, %arg2: memref<4x128xf32, #tpu.memory_space<vmem>>, %arg3: memref<1x128xf32, #tpu.memory_space<vmem>>, %arg4: memref<16x128xf32, #tpu.memory_space<vmem>>) attributes {dimension_semantics = [#tpu.dimension_semantics<parallel>], iteration_bounds = array<i64: 1>, scalar_prefetch = 0 : i64, scratch_operands = 0 : i64, tpu.core_type = #tpu.core_type<tc>, window_params = [{transform_indices = @transform_0, window_bounds = array<i64: 16, 4>}, {pipeline_mode = #tpu.pipeline_mode<synchronous>, transform_indices = @transform_1, window_bounds = array<i64: 4, 128>}, {pipeline_mode = #tpu.pipeline_mode<synchronous>, transform_indices = @transform_2, window_bounds = array<i64: 1, 128>}, {transform_indices = @transform_3, window_bounds = array<i64: 16, 128>}]} {
    %c0 = arith.constant 0 : index
    %c0_0 = arith.constant 0 : index
    %0 = vector.load %arg1[%c0, %c0_0] : memref<16x4xf32, #tpu.memory_space<vmem>>, vector<16x4xf32>
    %c0_1 = arith.constant 0 : index
    %c0_2 = arith.constant 0 : index
    %1 = vector.load %arg2[%c0_1, %c0_2] : memref<4x128xf32, #tpu.memory_space<vmem>>, vector<4x128xf32>
    %cst = arith.constant dense<0.000000e+00> : vector<16x128xf32>
    %2 = tpu.matmul %0, %1, %cst {dimension_numbers = #tpu.dot_dimension_numbers<[1], [0], [0], [1], [0, 0, 1, 1], [], []>} : vector<16x4xf32>, vector<4x128xf32>, vector<16x128xf32> -> vector<16x128xf32>
    %c0_3 = arith.constant 0 : index
    %c0_4 = arith.constant 0 : index
    %3 = vector.load %arg3[%c0_3, %c0_4] : memref<1x128xf32, #tpu.memory_space<vmem>>, vector<1x128xf32>
    %4 = vector.broadcast %3 : vector<1x128xf32> to vector<16x128xf32>
    %5 = arith.addf %2, %4 : vector<16x128xf32>
    %c0_5 = arith.constant 0 : index
    %c0_6 = arith.constant 0 : index
    %6 = vector.load %arg4[%c0_5, %c0_6] : memref<16x128xf32, #tpu.memory_space<vmem>>, vector<16x128xf32>
    tpu.vector_store %arg4[%c0_5, %c0_6], %5 {strides = array<i32>} : memref<16x128xf32, #tpu.memory_space<vmem>>, vector<16x128xf32>,
    return
  }
  func.func @transform_0(%arg0: i32) -> (i32, i32) {
    %c0_i32 = arith.constant 0 : i32
    %c0_i32_0 = arith.constant 0 : i32
    return %arg0, %c0_i32 : i32, i32
  }
  func.func @transform_1(%arg0: i32) -> (i32, i32) {
    %c0_i32 = arith.constant 0 : i32
    %c0_i32_0 = arith.constant 0 : i32
    %c0_i32_1 = arith.constant 0 : i32
    return %c0_i32, %c0_i32_0 : i32, i32
  }
  func.func @transform_2(%arg0: i32) -> (i32, i32) {
    %c0_i32 = arith.constant 0 : i32
    %c0_i32_0 = arith.constant 0 : i32
    %c0_i32_1 = arith.constant 0 : i32
    return %c0_i32, %c0_i32_0 : i32, i32
  }
  func.func @transform_3(%arg0: i32) -> (i32, i32) {
    %c0_i32 = arith.constant 0 : i32
    %c0_i32_0 = arith.constant 0 : i32
    return %arg0, %c0_i32 : i32, i32
  }
}

</mosaic_0001>

<bundles_post_ra>
// kernel: tpu_custom_call.1
= control target key start
LH: loop header
LB: loop body
LE: loop exit
PB: predicated region body
PF: predicated region fallthrough
CT: control target
= control target key end

     0   :  { %vm32_vm0 = vcmask 1043456   ;;  %vm25_vm1 = vcmask 31744   ;;  %s215_s0 = inlined_call_operand.vmem [shape: f32[16,4], index: 0, kind: input, shape index: {}]   ;;  %s216_s1 = inlined_call_operand.vmem [shape: f32[4,128], index: 1, kind: input, shape index: {}]   ;;  %s217_s2 = inlined_call_operand.vmem [shape: f32[1,128], index: 2, kind: input, shape index: {}]   ;;  %s218_s3 = inlined_call_operand.hbm [shape: f32[16,128], index: 3, kind: output, shape index: {}]  }
   0x1   :  { %v17_v0 = vld [vmem:[%s216_s1] sm:$0xf]  ;;  %v16_v2 = vld [vmem:[%s215_s0 + $0x8] sm:$0xff] }
   0x2   :  { %v15_v1 = vld [vmem:[%s215_s0] sm:$0xff]  ;;  %136 = vmatprep.subr.msk.mxu0 %vm32_vm0, %v17_v0 }
   0x3   :  { %138 = vmatprep.mubr.msk.f32.mxu0 %vm25_vm1, %v15_v1 }
   0x4   :  { %8 = vsyncpa [#allocation3], 0  ;;  %137 = vmatpush3.msk.msra.mxu0 %vm32_vm0, %v17_v0  ;;  %v129_v3 = vld [vmem:[%s217_s2] ss:$0 sm:$0xff]  ;;  %s168_s1 = smov [#allocation2]  }
   0x5   :  { %139 = vmatmul.mubr.msk.f32.vlgmr.msra.gmra.mrb[0].mxu0 %vm25_vm1, %v16_v2  ;;  %s118_s20 = sshll.u32 %s168_s1, 4  ;;  %s119_s20 = int_to_ptr.vmem [resolvable:$true] %s118_s20 }
   0x6   :  { %s144_s21 = scalar_lea.vmem %s119_s20, 256  ;;  %p149_p1 = scmp.lt.s32.totalorder %s119_s20, %s119_s20 }
   0x7   :  { %p145_p0 = scmp.ne.s32.totalorder %s119_s20, %s144_s21  ;;  %p150_p2 = scmp.lt.s32.totalorder %s144_s21, %s144_s21 }
   0x9   :  { %p151_p3 = por %p150_p2, %p149_p1 }
   0xb   :  { %p152_p4 = pnand %p151_p3, %p145_p0 }
  0xd8   :  { %v140_v4 = vpop.f32.mrb[0].mxu0 }
  0xd9   :  { %v108_v5 = vadd.f32 %v140_v4, %v129_v3  ;;  %v102_v6 = vpop.f32.mrb[1].mxu0 }
  0xda   :  { %v103_v7 = vadd.f32 %v129_v3, %v102_v6 }
  0xdb   :  { %112 = vst [vmem:[#allocation2 + $0x8] sm:$0xff] %v108_v5 }
  0xdc   :  { %111 = vst [vmem:[#allocation2] sm:$0xff] %v103_v7 }
  0xdd   :  { %155 = shalt.err (!%p152_p4)
}
  0xde   :  { %s156_s2 = scalar_lea.hbm %s218_s3, 256 }
  0xdf   :  { %p157_p5 = scmp.ne.s32.totalorder %s218_s3, %s156_s2  ;;  %p160_p6 = scmp.lt.u32.totalorder %s156_s2, %s218_s3 }
  0xe1   :  { %p162_p7 = pnand %p160_p6, %p157_p5 }
  0xe3   :  { %165 = shalt.err (!%p162_p7)
}
  0xe4   :  { %s169_s27 = smov 128   ;;  %s170_s28 = smov 8  }
  0xe5   :  { %124 = dma.vmem_to_hbm [thread:$0]  %s119_s20, 256, %s218_s3, [#allocation3], %s169_s27, %s169_s27, %s170_s28  }
  0xe6   :  { %166 = dma.done.wait [#allocation3], 256  }
  0xe7   :  { %167 = vsyncadd [#allocation3], 4294967040 }
  0xe8   :  { %128 = vsyncpa [#allocation3], 1 }

</bundles_post_ra>
